<compile_context>
chip_gen: v7x
topology: tpu7x:2x2x1
jax: 0.10.0
libtpu: 0.0.40
codegen_flags: <defaults>
</compile_context>

<pallas_src>
import jax
import jax.numpy as jnp
from jax.experimental import pallas as pl
from jax.experimental.pallas import tpu as pltpu

N_CLASSES = 10
N_CLASSES_PAD = 128      # lane-dense output: pad 10 -> 128
H3_PAD = 128             # pad fc3 output 64 -> 128 (keeps vregs full)
NEG_INF = -1e30          # padded-class bias -> never wins max, exp() == 0


def classifier_kernel(x_ref,
                      w1_ref, b1_ref,
                      w2_ref, b2_ref,
                      w3_ref, b3_ref,
                      w4_ref, b4_ref,
                      o_ref):
    # x tile arrives in its source dtype (f32); cast to bf16 here so the HBM
    # stream is never duplicated by a wrapper-side cast. MXU matmuls
    # accumulate in f32; bias/ReLU/log-softmax stay f32 (v5e VPU has no bf16).
    x = x_ref[...].astype(jnp.bfloat16)

    h1 = jnp.dot(x, w1_ref[...], preferred_element_type=jnp.float32) + b1_ref[...]
    h1 = jnp.maximum(h1, 0.0)

    h2 = jnp.dot(h1.astype(jnp.bfloat16), w2_ref[...],
                 preferred_element_type=jnp.float32) + b2_ref[...]
    h2 = jnp.maximum(h2, 0.0)

    h3 = jnp.dot(h2.astype(jnp.bfloat16), w3_ref[...],
                 preferred_element_type=jnp.float32) + b3_ref[...]
    h3 = jnp.maximum(h3, 0.0)

    z = jnp.dot(h3.astype(jnp.bfloat16), w4_ref[...],
                preferred_element_type=jnp.float32) + b4_ref[...]

    # log_softmax over the 128-wide padded class axis; padded columns carry
    # bias -1e30, so they never win the max and add exp(-huge) == 0 to the sum.
    m = jnp.max(z, axis=-1, keepdims=True)
    s = z - m
    lse = jnp.log(jnp.sum(jnp.exp(s), axis=-1, keepdims=True))
    o_ref[...] = (s - lse).astype(o_ref.dtype)


def _round_up(v, m):
    return ((v + m - 1) // m) * m


def prepare_params(params):
    """Cast/pad params for the kernel.

    params: list of (w, b), w (in, out) f32 (already W^T of the PyTorch layout),
            b (1, out) f32.
    Returns bf16 weights and f32 biases with fc3/fc4 padded to lane-dense widths.
    """
    (w1, b1), (w2, b2), (w3, b3), (w4, b4) = params

    # fc3: zero-pad output 64 -> 128 (ReLU(0 + 0) == 0, harmless).
    w3p = jnp.pad(w3, ((0, 0), (0, H3_PAD - w3.shape[1])))
    b3p = jnp.pad(b3, ((0, 0), (0, H3_PAD - b3.shape[1])))

    # fc4: zero-pad input rows 64 -> 128, output cols 10 -> 128; padded class
    # columns get bias NEG_INF so the 128-lane log_softmax equals the 10-class
    # result on the first 10 columns.
    w4p = jnp.pad(w4, ((0, H3_PAD - w4.shape[0]), (0, N_CLASSES_PAD - w4.shape[1])))
    b4p = jnp.pad(b4, ((0, 0), (0, N_CLASSES_PAD - b4.shape[1])),
                  constant_values=NEG_INF)

    return (w1.astype(jnp.bfloat16), b1.astype(jnp.float32),
            w2.astype(jnp.bfloat16), b2.astype(jnp.float32),
            w3p.astype(jnp.bfloat16), b3p.astype(jnp.float32),
            w4p.astype(jnp.bfloat16), b4p.astype(jnp.float32))


def classifier_forward(x, params, *, block_b=1024):
    """x: (B, 1, 28, 28) or (B, 784), any float dtype. Returns (B, 10) log-probs."""
    B = x.shape[0]
    x2d = x.reshape(B, -1)            # flatten only — no wrapper cast, no pad
    D = x2d.shape[1]

    # Batch tile: multiple of 8 sublanes, capped at block_b, and sized so the
    # grid has >= 2 steps whenever B allows (v7x megacore shards the
    # "parallel" axis across its 2 TensorCores).
    tb = max(8, min(block_b, _round_up(pl.cdiv(B, 2), 8), _round_up(B, 8)))
    grid_b = pl.cdiv(B, tb)           # ragged last block handled by Pallas

    w1, b1, w2, b2, w3, b3, w4, b4 = prepare_params(params)

    def resident(a):
        # Same block index every grid step -> DMA'd once, stays VMEM-resident.
        return pl.BlockSpec(a.shape, lambda i: (0, 0))

    param_bytes = sum(int(a.size) * a.dtype.itemsize
                      for a in (w1, b1, w2, b2, w3, b3, w4, b4))
    flops = 2 * B * (D * 256 + 256 * 128 + 128 * H3_PAD + H3_PAD * N_CLASSES_PAD)
    bytes_accessed = int(B * (D * x2d.dtype.itemsize + N_CLASSES_PAD * 4)
                         + param_bytes)

    out = pl.pallas_call(
        classifier_kernel,
        out_shape=jax.ShapeDtypeStruct((B, N_CLASSES_PAD), jnp.float32),
        grid=(grid_b,),
        in_specs=[pl.BlockSpec((tb, D), lambda i: (i, 0)),
                  resident(w1), resident(b1),
                  resident(w2), resident(b2),
                  resident(w3), resident(b3),
                  resident(w4), resident(b4)],
        out_specs=pl.BlockSpec((tb, N_CLASSES_PAD), lambda i: (i, 0)),
        compiler_params=pltpu.CompilerParams(
            dimension_semantics=("parallel",),
            vmem_limit_bytes=48 * 1024 * 1024),
        cost_estimate=pl.CostEstimate(
            flops=int(flops),
            transcendentals=int(B * (N_CLASSES_PAD + 1)),
            bytes_accessed=bytes_accessed),
    )(x2d, w1, b1, w2, b2, w3, b3, w4, b4)

    # Downstream consumers that tolerate the padded (B, 128) block can skip
    # this slice; kept here to match the module's (B, 10) contract.
    return out[:, :N_CLASSES]


def init_params(key):
    """Deterministic init mimicking nn.Linear shapes; weights stored as (in, out)."""
    dims = [784, 256, 128, 64, 10]
    params = []
    for fan_in, fan_out in zip(dims[:-1], dims[1:]):
        kw, kb, key = jax.random.split(key, 3)
        bound = 1.0 / jnp.sqrt(fan_in)
        w = jax.random.uniform(kw, (fan_in, fan_out), jnp.float32, -bound, bound)
        b = jax.random.uniform(kb, (1, fan_out), jnp.float32, -bound, bound)
        params.append((w, b))
    return params


def reference_forward_f32(x, params):
    """Pure-f32 reference matching the original PyTorch module semantics."""
    B = x.shape[0]
    h = x.reshape(B, -1).astype(jnp.float32)
    for i, (w, b) in enumerate(params):
        h = h @ w + b
        if i < 3:
            h = jnp.maximum(h, 0.0)
    return jax.nn.log_softmax(h, axis=1)


def reference_forward_bf16(x, params):
    """Reference matching the kernel's mixed precision (bf16 operands, f32 acc)."""
    B = x.shape[0]
    h = x.reshape(B, -1).astype(jnp.bfloat16)
    for i, (w, b) in enumerate(params):
        h = jnp.dot(h, w.astype(jnp.bfloat16),
                    preferred_element_type=jnp.float32) + b
        if i < 3:
            h = jnp.maximum(h, 0.0).astype(jnp.bfloat16)
    return jax.nn.log_softmax(h, axis=1)


if __name__ == "__main__":
    key = jax.random.PRNGKey(0)
    kx, kp = jax.random.split(key)

    # Small MNIST-like batch: (B, 1, 28, 28) -> flattened to (B, 784)
    x = jax.random.normal(kx, (8, 1, 28, 28), jnp.float32)
    params = init_params(kp)

    out = classifier_forward(x, params)
    out = jax.block_until_ready(out)
    assert out.shape == (8, 10)

    # Tight check against a precision-matched (bf16 matmul) reference.
    ref_bf16 = reference_forward_bf16(x, params)
    assert jnp.allclose(out, ref_bf16, atol=2e-3, rtol=2e-3)

    # Looser check against the full-f32 reference (original module semantics).
    ref_f32 = reference_forward_f32(x, params)
    assert jnp.allclose(out, ref_f32, atol=5e-2, rtol=5e-2)

    print("KERNEL_OK")
</pallas_src>

<mosaic_0001>
module attributes {stable_mosaic.version = 11 : i64} {
  func.func @classifier_kernel(%arg0: i32, %arg1: memref<8x784xf32, #tpu.memory_space<vmem>>, %arg2: memref<784x256xbf16, #tpu.memory_space<vmem>>, %arg3: memref<1x256xf32, #tpu.memory_space<vmem>>, %arg4: memref<256x128xbf16, #tpu.memory_space<vmem>>, %arg5: memref<1x128xf32, #tpu.memory_space<vmem>>, %arg6: memref<128x128xbf16, #tpu.memory_space<vmem>>, %arg7: memref<1x128xf32, #tpu.memory_space<vmem>>, %arg8: memref<128x128xbf16, #tpu.memory_space<vmem>>, %arg9: memref<1x128xf32, #tpu.memory_space<vmem>>, %arg10: memref<8x128xf32, #tpu.memory_space<vmem>>) attributes {dimension_semantics = [#tpu.dimension_semantics<parallel>], iteration_bounds = array<i64: 1>, scalar_prefetch = 0 : i64, scratch_operands = 0 : i64, tpu.core_type = #tpu.core_type<tc>, window_params = [{transform_indices = @transform_0, window_bounds = array<i64: 8, 784>}, {pipeline_mode = #tpu.pipeline_mode<synchronous>, transform_indices = @transform_1, window_bounds = array<i64: 784, 256>}, {pipeline_mode = #tpu.pipeline_mode<synchronous>, transform_indices = @transform_2, window_bounds = array<i64: 1, 256>}, {pipeline_mode = #tpu.pipeline_mode<synchronous>, transform_indices = @transform_3, window_bounds = array<i64: 256, 128>}, {pipeline_mode = #tpu.pipeline_mode<synchronous>, transform_indices = @transform_4, window_bounds = array<i64: 1, 128>}, {pipeline_mode = #tpu.pipeline_mode<synchronous>, transform_indices = @transform_5, window_bounds = array<i64: 128, 128>}, {pipeline_mode = #tpu.pipeline_mode<synchronous>, transform_indices = @transform_6, window_bounds = array<i64: 1, 128>}, {pipeline_mode = #tpu.pipeline_mode<synchronous>, transform_indices = @transform_7, window_bounds = array<i64: 128, 128>}, {pipeline_mode = #tpu.pipeline_mode<synchronous>, transform_indices = @transform_8, window_bounds = array<i64: 1, 128>}, {transform_indices = @transform_9, window_bounds = array<i64: 8, 128>}]} {
    %c0 = arith.constant 0 : index
    %c0_0 = arith.constant 0 : index
    %0 = vector.load %arg1[%c0, %c0_0] : memref<8x784xf32, #tpu.memory_space<vmem>>, vector<8x784xf32>
    %1 = arith.truncf %0 : vector<8x784xf32> to vector<8x784xbf16>
    %c0_1 = arith.constant 0 : index
    %c0_2 = arith.constant 0 : index
    %2 = vector.load %arg2[%c0_1, %c0_2] : memref<784x256xbf16, #tpu.memory_space<vmem>>, vector<784x256xbf16>
    %cst = arith.constant dense<0.000000e+00> : vector<8x256xf32>
    %3 = tpu.matmul %1, %2, %cst {dimension_numbers = #tpu.dot_dimension_numbers<[1], [0], [0], [1], [0, 0, 1, 1], [], []>} : vector<8x784xbf16>, vector<784x256xbf16>, vector<8x256xf32> -> vector<8x256xf32>
    %c0_3 = arith.constant 0 : index
    %c0_4 = arith.constant 0 : index
    %4 = vector.load %arg3[%c0_3, %c0_4] : memref<1x256xf32, #tpu.memory_space<vmem>>, vector<1x256xf32>
    %5 = vector.broadcast %4 : vector<1x256xf32> to vector<8x256xf32>
    %6 = arith.addf %3, %5 : vector<8x256xf32>
    %cst_5 = arith.constant 0.000000e+00 : f32
    %7 = vector.broadcast %cst_5 : f32 to vector<8x256xf32>
    %8 = arith.maximumf %6, %7 : vector<8x256xf32>
    %9 = arith.truncf %8 : vector<8x256xf32> to vector<8x256xbf16>
    %c0_6 = arith.constant 0 : index
    %c0_7 = arith.constant 0 : index
    %10 = vector.load %arg4[%c0_6, %c0_7] : memref<256x128xbf16, #tpu.memory_space<vmem>>, vector<256x128xbf16>
    %cst_8 = arith.constant dense<0.000000e+00> : vector<8x128xf32>
    %11 = tpu.matmul %9, %10, %cst_8 {dimension_numbers = #tpu.dot_dimension_numbers<[1], [0], [0], [1], [0, 0, 1, 1], [], []>} : vector<8x256xbf16>, vector<256x128xbf16>, vector<8x128xf32> -> vector<8x128xf32>
    %c0_9 = arith.constant 0 : index
    %c0_10 = arith.constant 0 : index
    %12 = vector.load %arg5[%c0_9, %c0_10] : memref<1x128xf32, #tpu.memory_space<vmem>>, vector<1x128xf32>
    %13 = vector.broadcast %12 : vector<1x128xf32> to vector<8x128xf32>
    %14 = arith.addf %11, %13 : vector<8x128xf32>
    %cst_11 = arith.constant 0.000000e+00 : f32
    %15 = vector.broadcast %cst_11 : f32 to vector<8x128xf32>
    %16 = arith.maximumf %14, %15 : vector<8x128xf32>
    %17 = arith.truncf %16 : vector<8x128xf32> to vector<8x128xbf16>
    %c0_12 = arith.constant 0 : index
    %c0_13 = arith.constant 0 : index
    %18 = vector.load %arg6[%c0_12, %c0_13] : memref<128x128xbf16, #tpu.memory_space<vmem>>, vector<128x128xbf16>
    %cst_14 = arith.constant dense<0.000000e+00> : vector<8x128xf32>
    %19 = tpu.matmul %17, %18, %cst_14 {dimension_numbers = #tpu.dot_dimension_numbers<[1], [0], [0], [1], [0, 0, 1, 1], [], []>} : vector<8x128xbf16>, vector<128x128xbf16>, vector<8x128xf32> -> vector<8x128xf32>
    %c0_15 = arith.constant 0 : index
    %c0_16 = arith.constant 0 : index
    %20 = vector.load %arg7[%c0_15, %c0_16] : memref<1x128xf32, #tpu.memory_space<vmem>>, vector<1x128xf32>
    %21 = vector.broadcast %20 : vector<1x128xf32> to vector<8x128xf32>
    %22 = arith.addf %19, %21 : vector<8x128xf32>
    %cst_17 = arith.constant 0.000000e+00 : f32
    %23 = vector.broadcast %cst_17 : f32 to vector<8x128xf32>
    %24 = arith.maximumf %22, %23 : vector<8x128xf32>
    %25 = arith.truncf %24 : vector<8x128xf32> to vector<8x128xbf16>
    %c0_18 = arith.constant 0 : index
    %c0_19 = arith.constant 0 : index
    %26 = vector.load %arg8[%c0_18, %c0_19] : memref<128x128xbf16, #tpu.memory_space<vmem>>, vector<128x128xbf16>
    %cst_20 = arith.constant dense<0.000000e+00> : vector<8x128xf32>
    %27 = tpu.matmul %25, %26, %cst_20 {dimension_numbers = #tpu.dot_dimension_numbers<[1], [0], [0], [1], [0, 0, 1, 1], [], []>} : vector<8x128xbf16>, vector<128x128xbf16>, vector<8x128xf32> -> vector<8x128xf32>
    %c0_21 = arith.constant 0 : index
    %c0_22 = arith.constant 0 : index
    %28 = vector.load %arg9[%c0_21, %c0_22] : memref<1x128xf32, #tpu.memory_space<vmem>>, vector<1x128xf32>
    %29 = vector.broadcast %28 : vector<1x128xf32> to vector<8x128xf32>
    %30 = arith.addf %27, %29 : vector<8x128xf32>
    %cst_23 = arith.constant dense<0xFF800000> : vector<8xf32>
    %31 = vector.multi_reduction <maximumf>, %30, %cst_23 [1] : vector<8x128xf32> to vector<8xf32>
    %32 = vector.shape_cast %31 : vector<8xf32> to vector<8x1xf32>
    %33 = vector.broadcast %32 : vector<8x1xf32> to vector<8x128xf32>
    %34 = arith.subf %30, %33 : vector<8x128xf32>
    %35 = math.exp %34 : vector<8x128xf32>
    %cst_24 = arith.constant dense<0.000000e+00> : vector<8xf32>
    %36 = vector.multi_reduction <add>, %35, %cst_24 [1] : vector<8x128xf32> to vector<8xf32>
    %37 = vector.shape_cast %36 : vector<8xf32> to vector<8x1xf32>
    %38 = math.log %37 : vector<8x1xf32>
    %39 = vector.broadcast %38 : vector<8x1xf32> to vector<8x128xf32>
    %40 = arith.subf %34, %39 : vector<8x128xf32>
    %c0_25 = arith.constant 0 : index
    %c0_26 = arith.constant 0 : index
    %41 = vector.load %arg10[%c0_25, %c0_26] : memref<8x128xf32, #tpu.memory_space<vmem>>, vector<8x128xf32>
    tpu.vector_store %arg10[%c0_25, %c0_26], %40 {strides = array<i32>} : memref<8x128xf32, #tpu.memory_space<vmem>>, vector<8x128xf32>,
    return
  }
  func.func @transform_0(%arg0: i32) -> (i32, i32) {
    %c0_i32 = arith.constant 0 : i32
    %c0_i32_0 = arith.constant 0 : i32
    return %arg0, %c0_i32 : i32, i32
  }
  func.func @transform_1(%arg0: i32) -> (i32, i32) {
    %c0_i32 = arith.constant 0 : i32
    %c0_i32_0 = arith.constant 0 : i32
    %c0_i32_1 = arith.constant 0 : i32
    return %c0_i32, %c0_i32_0 : i32, i32
  }
  func.func @transform_2(%arg0: i32) -> (i32, i32) {
    %c0_i32 = arith.constant 0 : i32
    %c0_i32_0 = arith.constant 0 : i32
    %c0_i32_1 = arith.constant 0 : i32
    return %c0_i32, %c0_i32_0 : i32, i32
  }
  func.func @transform_3(%arg0: i32) -> (i32, i32) {
    %c0_i32 = arith.constant 0 : i32
    %c0_i32_0 = arith.constant 0 : i32
    %c0_i32_1 = arith.constant 0 : i32
    return %c0_i32, %c0_i32_0 : i32, i32
  }
  func.func @transform_4(%arg0: i32) -> (i32, i32) {
    %c0_i32 = arith.constant 0 : i32
    %c0_i32_0 = arith.constant 0 : i32
    %c0_i32_1 = arith.constant 0 : i32
    return %c0_i32, %c0_i32_0 : i32, i32
  }
  func.func @transform_5(%arg0: i32) -> (i32, i32) {
    %c0_i32 = arith.constant 0 : i32
    %c0_i32_0 = arith.constant 0 : i32
    %c0_i32_1 = arith.constant 0 : i32
    return %c0_i32, %c0_i32_0 : i32, i32
  }
  func.func @transform_6(%arg0: i32) -> (i32, i32) {
    %c0_i32 = arith.constant 0 : i32
    %c0_i32_0 = arith.constant 0 : i32
    %c0_i32_1 = arith.constant 0 : i32
    return %c0_i32, %c0_i32_0 : i32, i32
  }
  func.func @transform_7(%arg0: i32) -> (i32, i32) {
    %c0_i32 = arith.constant 0 : i32
    %c0_i32_0 = arith.constant 0 : i32
    %c0_i32_1 = arith.constant 0 : i32
    return %c0_i32, %c0_i32_0 : i32, i32
  }
  func.func @transform_8(%arg0: i32) -> (i32, i32) {
    %c0_i32 = arith.constant 0 : i32
    %c0_i32_0 = arith.constant 0 : i32
    %c0_i32_1 = arith.constant 0 : i32
    return %c0_i32, %c0_i32_0 : i32, i32
  }
  func.func @transform_9(%arg0: i32) -> (i32, i32) {
    %c0_i32 = arith.constant 0 : i32
    %c0_i32_0 = arith.constant 0 : i32
    return %arg0, %c0_i32 : i32, i32
  }
}

</mosaic_0001>

<bundles_post_ra>
// kernel: tpu_custom_call.1
= control target key start
LH: loop header
LB: loop body
LE: loop exit
PB: predicated region body
PF: predicated region fallthrough
CT: control target
= control target key end

     0   :  { %14 = vsyncpa [#allocation3], 0  ;;  %s2051_s0 = inlined_call_operand.hbm [shape: f32[8,784], index: 0, kind: input, shape index: {}]   ;;  %s2052_s1 = inlined_call_operand.hbm [shape: bf16[784,256], index: 1, kind: input, shape index: {}]   ;;  %s2053_s2 = inlined_call_operand.vmem [shape: f32[1,256], index: 2, kind: input, shape index: {}]   ;;  %s2054_s3 = inlined_call_operand.hbm [shape: bf16[256,128], index: 3, kind: input, shape index: {}]   ;;  %s2055_s4 = inlined_call_operand.vmem [shape: f32[1,128], index: 4, kind: input, shape index: {}]   ;;  %s2056_s5 = inlined_call_operand.hbm [shape: bf16[128,128], index: 5, kind: input, shape index: {}]   ;;  %s2057_s6 = inlined_call_operand.vmem [shape: f32[1,128], index: 6, kind: input, shape index: {}]   ;;  %s2058_s7 = inlined_call_operand.hbm [shape: bf16[128,128], index: 7, kind: input, shape index: {}]   ;;  %s2059_s8 = inlined_call_operand.vmem [shape: f32[1,128], index: 8, kind: input, shape index: {}]   ;;  %s2060_s9 = inlined_call_operand.hbm [shape: f32[8,128], index: 9, kind: output, shape index: {}]  }
   0x1   :  { %15 = vsyncpa [#allocation6], 0 }
   0x2   :  { %16 = vsyncpa [#allocation9], 0 }
   0x3   :  { %17 = vsyncpa [#allocation4], 0  ;;  %s1877_s30 = smov [#allocation5]   ;;  %s1737_s13 = scalar_lea.hbm %s2052_s1, 12544 }
   0x4   :  { %s33_s10 = sshll.u32 %s1877_s30, 4  ;;  %p1738_p0 = scmp.ne.s32.totalorder %s2052_s1, %s1737_s13  ;;  %s34_s10 = int_to_ptr.vmem [resolvable:$true] %s33_s10 }
   0x5   :  { %p1741_p1 = scmp.lt.u32.totalorder %s1737_s13, %s2052_s1 }
   0x7   :  { %p1743_p2 = pnand %p1741_p1, %p1738_p0 }
   0x9   :  { %1746 = shalt.err (!%p1743_p2)
}
   0xa   :  { %s1747_s18 = scalar_lea.vmem %s34_s10, 12544  ;;  %p1752_p4 = scmp.lt.s32.totalorder %s34_s10, %s34_s10 }
   0xb   :  { %p1748_p3 = scmp.ne.s32.totalorder %s34_s10, %s1747_s18  ;;  %p1753_p5 = scmp.lt.s32.totalorder %s1747_s18, %s1747_s18 }
   0xd   :  { %p1754_p6 = por %p1753_p5, %p1752_p4 }
   0xf   :  { %p1755_p7 = pnand %p1754_p6, %p1748_p3 }
  0x11   :  { %1758 = shalt.err (!%p1755_p7)
}
  0x12   :  { %s1878_s19 = smov 128   ;;  %s1879_s20 = smov 8  }
  0x13   :  { %39 = dma.hbm_to_vmem [thread:$0]  %s2052_s1, 12544, %s34_s10, [#allocation6], %s1878_s19, %s1878_s19, %s1879_s20  }
  0x14   :  { %s1880_s23 = smov [#allocation8]   ;;  %s1881_s25 = smov [#allocation2]  }
  0x15   :  { %s61_s24 = sshll.u32 %s1880_s23, 4  ;;  %s24_s26 = sshll.u32 %s1881_s25, 4  ;;  %s62_s24 = int_to_ptr.vmem [resolvable:$true] %s61_s24  ;;  %s25_s26 = int_to_ptr.vmem [resolvable:$true] %s24_s26 }
  0x16   :  { %s1759_s29 = scalar_lea.hbm %s2056_s5, 1024 }
  0x17   :  { %p1760_p8 = scmp.ne.s32.totalorder %s2056_s5, %s1759_s29  ;;  %p1763_p9 = scmp.lt.u32.totalorder %s1759_s29, %s2056_s5 }
  0x19   :  { %p1765_p10 = pnand %p1763_p9, %p1760_p8 }
  0x1b   :  { %1768 = shalt.err (!%p1765_p10)
}
  0x1c   :  { %s1769_s1 = scalar_lea.vmem %s62_s24, 1024  ;;  %p1774_p12 = scmp.lt.s32.totalorder %s62_s24, %s62_s24 }
  0x1d   :  { %p1770_p11 = scmp.ne.s32.totalorder %s62_s24, %s1769_s1  ;;  %p1775_p13 = scmp.lt.s32.totalorder %s1769_s1, %s1769_s1 }
  0x1f   :  { %p1776_p0 = por %p1775_p13, %p1774_p12 }
  0x21   :  { %p1777_p1 = pnand %p1776_p0, %p1770_p11 }
  0x23   :  { %1780 = shalt.err (!%p1777_p1)
}
  0x24   :  { %s1882_s10 = smov 64   ;;  %s1883_s14 = smov 4  }
  0x25   :  { %67 = dma.hbm_to_vmem [thread:$0]  %s2056_s5, 1024, %s62_s24, [#allocation9], %s1882_s10, %s1882_s10, %s1883_s14  }
  0x26   :  { %s1781_s19 = scalar_lea.hbm %s2051_s0, 896 }
  0x27   :  { %p1782_p2 = scmp.ne.s32.totalorder %s2051_s0, %s1781_s19  ;;  %p1785_p3 = scmp.lt.u32.totalorder %s1781_s19, %s2051_s0 }
  0x29   :  { %p1787_p4 = pnand %p1785_p3, %p1782_p2 }
  0x2b   :  { %1790 = shalt.err (!%p1787_p4)
}
  0x2c   :  { %s1791_s25 = scalar_lea.vmem %s25_s26, 896  ;;  %p1796_p6 = scmp.lt.s32.totalorder %s25_s26, %s25_s26 }
  0x2d   :  { %p1792_p5 = scmp.ne.s32.totalorder %s25_s26, %s1791_s25  ;;  %p1797_p7 = scmp.lt.s32.totalorder %s1791_s25, %s1791_s25 }
  0x2f   :  { %p1798_p8 = por %p1797_p7, %p1796_p6 }
  0x31   :  { %p1799_p9 = pnand %p1798_p8, %p1792_p5 }
  0x33   :  { %1802 = shalt.err (!%p1799_p9)
}
  0x34   :  { %27 = dma.hbm_to_vmem [thread:$0]  %s2051_s0, 896, %s25_s26, [#allocation3]  }
  0x35   :  { %s1884_s27 = smov [#allocation7]   ;;  %s1885_s29 = smov [#allocation10]  }
  0x36   :  { %s47_s28 = sshll.u32 %s1884_s27, 4  ;;  %s75_s30 = sshll.u32 %s1885_s29, 4  ;;  %s48_s28 = int_to_ptr.vmem [resolvable:$true] %s47_s28  ;;  %s76_s30 = int_to_ptr.vmem [resolvable:$true] %s75_s30 }
  0x37   :  { %s1803_s13 = scalar_lea.hbm %s2054_s3, 2048 }
  0x38   :  { %p1804_p10 = scmp.ne.s32.totalorder %s2054_s3, %s1803_s13  ;;  %p1807_p11 = scmp.lt.u32.totalorder %s1803_s13, %s2054_s3 }
  0x3a   :  { %p1809_p12 = pnand %p1807_p11, %p1804_p10 }
  0x3c   :  { %1812 = shalt.err (!%p1809_p12)
}
  0x3d   :  { %s1813_s0 = scalar_lea.vmem %s48_s28, 2048  ;;  %p1818_p0 = scmp.lt.s32.totalorder %s48_s28, %s48_s28 }
  0x3e   :  { %p1814_p13 = scmp.ne.s32.totalorder %s48_s28, %s1813_s0  ;;  %p1819_p1 = scmp.lt.s32.totalorder %s1813_s0, %s1813_s0 }
  0x40   :  { %p1820_p2 = por %p1819_p1, %p1818_p0 }
  0x42   :  { %p1821_p3 = pnand %p1820_p2, %p1814_p13 }
  0x44   :  { %1824 = shalt.err (!%p1821_p3)
}
  0x45   :  { %53 = dma.hbm_to_vmem [thread:$0]  %s2054_s3, 2048, %s48_s28, [#allocation6], %s1882_s10, %s1882_s10, %s1883_s14  }
  0x46   :  { %s1825_s21 = scalar_lea.hbm %s2058_s7, 1024 }
  0x47   :  { %p1826_p4 = scmp.ne.s32.totalorder %s2058_s7, %s1825_s21  ;;  %p1829_p5 = scmp.lt.u32.totalorder %s1825_s21, %s2058_s7 }
  0x49   :  { %p1831_p6 = pnand %p1829_p5, %p1826_p4 }
  0x4b   :  { %1834 = shalt.err (!%p1831_p6)
}
  0x4c   :  { %s1835_s24 = scalar_lea.vmem %s76_s30, 1024  ;;  %p1840_p8 = scmp.lt.s32.totalorder %s76_s30, %s76_s30 }
  0x4d   :  { %p1836_p7 = scmp.ne.s32.totalorder %s76_s30, %s1835_s24  ;;  %p1841_p9 = scmp.lt.s32.totalorder %s1835_s24, %s1835_s24 }
  0x4f   :  { %p1842_p10 = por %p1841_p9, %p1840_p8 }
  0x51   :  { %p1843_p11 = pnand %p1842_p10, %p1836_p7 }
  0x53   :  { %1846 = shalt.err (!%p1843_p11)
}
  0x54   :  { %81 = dma.hbm_to_vmem [thread:$0]  %s2058_s7, 1024, %s76_s30, [#allocation9], %s1882_s10, %s1882_s10, %s1883_s14  }
  0x55   :  { %1869 = dma.done.wait [#allocation3], 896  }
  0x56   :  { %1870 = vsyncadd [#allocation3], 4294966400 }
  0x57   :  { %1871 = dma.done.wait [#allocation6], 14592  }
  0x58   :  { %1872 = vsyncadd [#allocation6], 4294952704 }
  0x59   :  { %1873 = dma.done.wait [#allocation9], 2048  }
  0x5a   :  { %1874 = vsyncadd [#allocation9], 4294965248  ;;  %v1554_v0 = vld [vmem:[#allocation5 + $0x104] ss:$8 sps:$4 sm:$0xff]   ;;  %v1556_v1 = vld [vmem:[#allocation5 + $0x100] ss:$8 sps:$4 sm:$0xff]  }
  0x5b   :  { %759 = vmatprep.subr.bf16.mxu0 %v1554_v0  ;;  %v1557_v2 = vld [vmem:[#allocation5 + $0x114] ss:$8 sps:$4 sm:$0xff]   ;;  %v1559_v3 = vld [vmem:[#allocation5 + $0x110] ss:$8 sps:$4 sm:$0xff]   ;;  %v1560_v4 = vld [vmem:[#allocation5 + $0x124] ss:$8 sps:$4 sm:$0xff]  }
  0x5c   :  { %760 = vmatpush1.bf16.msra.mxu0 %v1556_v1  ;;  %v1562_v5 = vld [vmem:[#allocation5 + $0x120] ss:$8 sps:$4 sm:$0xff]   ;;  %v1563_v6 = vld [vmem:[#allocation5 + $0x134] ss:$8 sps:$4 sm:$0xff]   ;;  %v1565_v7 = vld [vmem:[#allocation5 + $0x130] ss:$8 sps:$4 sm:$0xff]  }
  0x5d   :  { %761 = vmatprep.subr.bf16.mxu0 %v1557_v2  ;;  %v1566_v8 = vld [vmem:[#allocation5 + $0x144] ss:$8 sps:$4 sm:$0xff]   ;;  %v1568_v9 = vld [vmem:[#allocation5 + $0x140] ss:$8 sps:$4 sm:$0xff]   ;;  %v1569_v10 = vld [vmem:[#allocation5 + $0x154] ss:$8 sps:$4 sm:$0xff]  }
  0x5e   :  { %v1571_v11 = vld [vmem:[#allocation5 + $0x150] ss:$8 sps:$4 sm:$0xff]   ;;  %v1572_v12 = vld [vmem:[#allocation5 + $0x164] ss:$8 sps:$4 sm:$0xff]   ;;  %v1574_v15 = vld [vmem:[#allocation5 + $0x160] ss:$8 sps:$4 sm:$0xff]  }
  0x5f   :  { %v103_v13 = vld [vmem:[#allocation2 + $0x18] sm:$0xff]  ;;  %v1575_v16 = vld [vmem:[#allocation5 + $0x174] ss:$8 sps:$4 sm:$0xff]   ;;  %v1577_v18 = vld [vmem:[#allocation5 + $0x170] ss:$8 sps:$4 sm:$0xff]   ;;  %vm714_vm0 = vcmask 130048  }
  0x60   :  { %762 = vmatpush1.bf16.msra.mxu0 %v1559_v3  ;;  %v110_v14 = vpack.c.bf16 %v103_v13, %v103_v13  ;;  %v1608_v17 = vld [vmem:[#allocation5 + $0x4] ss:$8 sps:$4 sm:$0xff]   ;;  %v1613_v20 = vld [vmem:[#allocation5] ss:$8 sps:$4 sm:$0xff]   ;;  %v1614_v21 = vld [vmem:[#allocation5 + $0x14] ss:$8 sps:$4 sm:$0xff]  }
  0x61   :  { %763 = vmatprep.subr.bf16.mxu0 %v1560_v4  ;;  %v1578_v19 = vld [vmem:[#allocation5 + $0x184] ss:$8 sps:$4 sm:$0xff]   ;;  %718 = vmatprep.subr.bf16.mxu1 %v1608_v17  ;;  %v1619_v22 = vld [vmem:[#allocation5 + $0x10] ss:$8 sps:$4 sm:$0xff]   ;;  %v1580_v24 = vld [vmem:[#allocation5 + $0x180] ss:$8 sps:$4 sm:$0xff]  }
  0x62   :  { %791 = vmatprep.mubr.bf16.mxu0 %v110_v14  ;;  %719 = vmatpush1.bf16.msra.mxu1 %v1613_v20  ;;  %v1620_v23 = vld [vmem:[#allocation5 + $0x24] ss:$8 sps:$4 sm:$0xff]   ;;  %v1581_v25 = vld [vmem:[#allocation5 + $0x194] ss:$8 sps:$4 sm:$0xff]   ;;  %v1625_v26 = vld [vmem:[#allocation5 + $0x20] ss:$8 sps:$4 sm:$0xff]  }
  0x63   :  { %720 = vmatprep.subr.bf16.mxu1 %v1614_v21  ;;  %v1626_v27 = vld [vmem:[#allocation5 + $0x34] ss:$8 sps:$4 sm:$0xff]   ;;  %v1583_v28 = vld [vmem:[#allocation5 + $0x190] ss:$8 sps:$4 sm:$0xff]   ;;  %v1584_v29 = vld [vmem:[#allocation5 + $0x1a4] ss:$8 sps:$4 sm:$0xff]  }
  0x64   :  { %764 = vmatpush1.bf16.msra.mxu0 %v1562_v5  ;;  %v1631_v30 = vld [vmem:[#allocation5 + $0x30] ss:$8 sps:$4 sm:$0xff]   ;;  %v1632_v31 = vld [vmem:[#allocation5 + $0x44] ss:$8 sps:$4 sm:$0xff]   ;;  %v1586_v32 = vld [vmem:[#allocation5 + $0x1a0] ss:$8 sps:$4 sm:$0xff]  }
  0x65   :  { %765 = vmatprep.subr.bf16.mxu0 %v1563_v6  ;;  %v1587_v33 = vld [vmem:[#allocation5 + $0x1b4] ss:$8 sps:$4 sm:$0xff]   ;;  %v1637_v34 = vld [vmem:[#allocation5 + $0x40] ss:$8 sps:$4 sm:$0xff]   ;;  %v1589_v36 = vld [vmem:[#allocation5 + $0x1b0] ss:$8 sps:$4 sm:$0xff]  }
  0x66   :  { %721 = vmatpush1.bf16.msra.mxu1 %v1619_v22  ;;  %v1638_v35 = vld [vmem:[#allocation5 + $0x54] ss:$8 sps:$4 sm:$0xff]   ;;  %v1590_v37 = vld [vmem:[#allocation5 + $0x1c4] ss:$8 sps:$4 sm:$0xff]   ;;  %v1643_v38 = vld [vmem:[#allocation5 + $0x50] ss:$8 sps:$4 sm:$0xff]  }
  0x67   :  { %722 = vmatprep.subr.bf16.mxu1 %v1620_v23  ;;  %v1644_v39 = vld [vmem:[#allocation5 + $0x64] ss:$8 sps:$4 sm:$0xff]   ;;  %v1592_v40 = vld [vmem:[#allocation5 + $0x1c0] ss:$8 sps:$4 sm:$0xff]   ;;  %v1593_v41 = vld [vmem:[#allocation5 + $0x1d4] ss:$8 sps:$4 sm:$0xff]  }
  0x68   :  { %766 = vmatpush1.bf16.msra.mxu0 %v1565_v7  ;;  %v1649_v42 = vld [vmem:[#allocation5 + $0x60] ss:$8 sps:$4 sm:$0xff]   ;;  %v1650_v43 = vld [vmem:[#allocation5 + $0x74] ss:$8 sps:$4 sm:$0xff]   ;;  %v1595_v44 = vld [vmem:[#allocation5 + $0x1d0] ss:$8 sps:$4 sm:$0xff]  }
  0x69   :  { %767 = vmatprep.subr.bf16.mxu0 %v1566_v8  ;;  %v1596_v45 = vld [vmem:[#allocation5 + $0x1e4] ss:$8 sps:$4 sm:$0xff]   ;;  %v1655_v46 = vld [vmem:[#allocation5 + $0x70] ss:$8 sps:$4 sm:$0xff]   ;;  %v1598_v48 = vld [vmem:[#allocation5 + $0x1e0] ss:$8 sps:$4 sm:$0xff]  }
  0x6a   :  { %723 = vmatpush1.bf16.msra.mxu1 %v1625_v26  ;;  %v1656_v47 = vld [vmem:[#allocation5 + $0x84] ss:$8 sps:$4 sm:$0xff]   ;;  %v1599_v49 = vld [vmem:[#allocation5 + $0x1f4] ss:$8 sps:$4 sm:$0xff]   ;;  %v1661_v50 = vld [vmem:[#allocation5 + $0x80] ss:$8 sps:$4 sm:$0xff]  }
  0x6b   :  { %724 = vmatprep.subr.bf16.mxu1 %v1626_v27  ;;  %v1601_v51 = vld [vmem:[#allocation5 + $0x1f0] ss:$8 sps:$4 sm:$0xff]   ;;  %v1662_v52 = vld [vmem:[#allocation5 + $0x94] ss:$8 sps:$4 sm:$0xff]   ;;  %v1604_v54 = vld [vmem:[#allocation5 + $0x204] ss:$8 sps:$4 sm:$0xff]  }
  0x6c   :  { %768 = vmatpush1.bf16.msra.mxu0 %v1568_v9  ;;  %v102_v53 = vld [vmem:[#allocation2 + $0x10] sm:$0xff]  ;;  %v1668_v56 = vld [vmem:[#allocation5 + $0xa4] ss:$8 sps:$4 sm:$0xff]   ;;  %v105_v58 = vld [vmem:[#allocation2 + $0x28] sm:$0xff]  ;;  %vm1888_vm1 = vmmov 0  }
  0x6d   :  { %769 = vmatprep.subr.bf16.mxu0 %v1569_v10  ;;  %v1667_v55 = vld [vmem:[#allocation5 + $0x90] ss:$8 sps:$4 sm:$0xff]   ;;  %v109_v57 = vpack.c.bf16 %v102_v53, %v102_v53  ;;  %v1602_v59 = vld [vmem:[#allocation5 + $0x200] ss:$8 sps:$4 sm:$0xff]   ;;  %v112_v60 = vpack.c.bf16 %v105_v58, %v105_v58  ;;  %v1607_v61 = vld [vmem:[#allocation5 + $0x214] ss:$8 sps:$4 sm:$0xff]  }
  0x6e   :  { %725 = vmatpush1.bf16.msra.mxu1 %v1631_v30  ;;  %v1673_v62 = vld [vmem:[#allocation5 + $0xa0] ss:$8 sps:$4 sm:$0xff]   ;;  %v1674_v63 = vld [vmem:[#allocation5 + $0xb4] ss:$8 sps:$4 sm:$0xff]   ;;  %v1605_v1 = vld [vmem:[#allocation5 + $0x210] ss:$8 sps:$4 sm:$0xff]  }
  0x6f   :  { %726 = vmatprep.subr.bf16.mxu1 %v1632_v31  ;;  %v101_v0 = vld [vmem:[#allocation2 + $0x8] sm:$0xff]  ;;  %v1612_v3 = vld [vmem:[#allocation5 + $0x224] ss:$8 sps:$4 sm:$0xff]   ;;  %v1610_v6 = vld [vmem:[#allocation5 + $0x220] ss:$8 sps:$4 sm:$0xff]  }
  0x70   :  { %770 = vmatpush1.bf16.msra.mxu0 %v1571_v11  ;;  %v108_v2 = vpack.c.bf16 %v101_v0, %v101_v0  ;;  %v1679_v4 = vld [vmem:[#allocation5 + $0xb0] ss:$8 sps:$4 sm:$0xff]   ;;  %v1680_v5 = vld [vmem:[#allocation5 + $0xc4] ss:$8 sps:$4 sm:$0xff]   ;;  %v1618_v7 = vld [vmem:[#allocation5 + $0x234] ss:$8 sps:$4 sm:$0xff]  }
  0x71   :  { %771 = vmatprep.subr.bf16.mxu0 %v1572_v12  ;;  %v1685_v8 = vld [vmem:[#allocation5 + $0xc0] ss:$8 sps:$4 sm:$0xff]   ;;  %v1686_v9 = vld [vmem:[#allocation5 + $0xd4] ss:$8 sps:$4 sm:$0xff]   ;;  %v1616_v10 = vld [vmem:[#allocation5 + $0x230] ss:$8 sps:$4 sm:$0xff]  }
  0x72   :  { %727 = vmatpush1.bf16.msra.mxu1 %v1637_v34  ;;  %750 = vmatprep.mubr.bf16.mxu1 %v108_v2  ;;  %v1624_v11 = vld [vmem:[#allocation5 + $0x244] ss:$8 sps:$4 sm:$0xff]   ;;  %v1622_v12 = vld [vmem:[#allocation5 + $0x240] ss:$8 sps:$4 sm:$0xff]   ;;  %v1691_v13 = vld [vmem:[#allocation5 + $0xd0] ss:$8 sps:$4 sm:$0xff]  }
  0x73   :  { %728 = vmatprep.subr.bf16.mxu1 %v1638_v35  ;;  %v1692_v14 = vld [vmem:[#allocation5 + $0xe4] ss:$8 sps:$4 sm:$0xff]   ;;  %v1698_v17 = vld [vmem:[#allocation5 + $0xf4] ss:$8 sps:$4 sm:$0xff]   ;;  %v1700_v20 = vld [vmem:[#allocation5 + $0xf0] ss:$8 sps:$4 sm:$0xff]  }
  0x74   :  { %772 = vmatpush1.bf16.msra.mxu0 %v1574_v15  ;;  %v1630_v15 = vld [vmem:[#allocation5 + $0x254] ss:$8 sps:$4 sm:$0xff]   ;;  %v100_v21 = vld [vmem:[#allocation2] sm:$0xff]  ;;  %v1705_v31 = vld [vmem:[#allocation7 + $0x50] sm:$0xff]  }
  0x75   :  { %773 = vmatprep.subr.bf16.mxu0 %v1575_v16  ;;  %v1697_v16 = vld [vmem:[#allocation5 + $0xe0] ss:$8 sps:$4 sm:$0xff]   ;;  %v1701_v22 = vld [vmem:[#allocation7 + $0x40] sm:$0xff]   ;;  %v107_v26 = vpack.c.bf16 %v100_v21, %v100_v21  ;;  %v1703_v27 = vld [vmem:[#allocation7 + $0x48] sm:$0xff]  }
  0x76   :  { %729 = vmatpush1.bf16.msra.mxu1 %v1643_v38  ;;  %v1634_v23 = vld [vmem:[#allocation5 + $0x260] ss:$8 sps:$4 sm:$0xff]   ;;  %v1704_v30 = vld [vmem:[#allocation7 + $0x8] sm:$0xff]   ;;  %v1696_v53 = vld [vmem:[#allocation5 + $0x304] ss:$8 sps:$4 sm:$0xff]  }
  0x77   :  { %730 = vmatprep.subr.bf16.mxu1 %v1644_v39  ;;  %v1706_v34 = vld [vmem:[#allocation7 + $0x10] sm:$0xff]   ;;  %v1707_v35 = vld [vmem:[#allocation7 + $0x58] sm:$0xff]   ;;  %v1709_v39 = vld [vmem:[#allocation7 + $0x60] sm:$0xff]  }
  0x78   :  { %774 = vmatpush1.bf16.msra.mxu0 %v1577_v18  ;;  %v1628_v18 = vld [vmem:[#allocation5 + $0x250] ss:$8 sps:$4 sm:$0xff]   ;;  %v1708_v38 = vld [vmem:[#allocation7 + $0x18] sm:$0xff]  }
  0x79   :  { %775 = vmatprep.subr.bf16.mxu0 %v1578_v19  ;;  %v1636_v19 = vld [vmem:[#allocation5 + $0x264] ss:$8 sps:$4 sm:$0xff]  }
  0x7a   :  { %731 = vmatpush1.bf16.msra.mxu1 %v1649_v42  ;;  %v1710_v42 = vld [vmem:[#allocation7 + $0x20] sm:$0xff]   ;;  %v1716_v0 = vld [vmem:[#allocation7 + $0x38] sm:$0xff]  }
  0x7b   :  { %732 = vmatprep.subr.bf16.mxu1 %v1650_v43  ;;  %v1664_v43 = vld [vmem:[#allocation5 + $0x2b0] ss:$8 sps:$4 sm:$0xff]  }
  0x7c   :  { %776 = vmatpush1.bf16.msra.mxu0 %v1580_v24  ;;  %v1642_v24 = vld [vmem:[#allocation5 + $0x274] ss:$8 sps:$4 sm:$0xff]  }
  0x7d   :  { %777 = vmatprep.subr.bf16.mxu0 %v1581_v25  ;;  %v1702_v25 = vld [vmem:[#allocation7] sm:$0xff]  }
  0x7e   :  { %733 = vmatpush1.bf16.msra.mxu1 %v1655_v46  ;;  %v1678_v46 = vld [vmem:[#allocation5 + $0x2d4] ss:$8 sps:$4 sm:$0xff]  }
  0x7f   :  { %734 = vmatprep.subr.bf16.mxu1 %v1656_v47  ;;  %v1676_v47 = vld [vmem:[#allocation5 + $0x2d0] ss:$8 sps:$4 sm:$0xff]  }
  0x80   :  { %778 = vmatpush1.bf16.msra.mxu0 %v1583_v28  ;;  %v1640_v28 = vld [vmem:[#allocation5 + $0x270] ss:$8 sps:$4 sm:$0xff]  }
  0x81   :  { %779 = vmatprep.subr.bf16.mxu0 %v1584_v29  ;;  %v1648_v29 = vld [vmem:[#allocation5 + $0x284] ss:$8 sps:$4 sm:$0xff]  }
  0x82   :  { %735 = vmatpush1.bf16.msra.mxu1 %v1661_v50  ;;  %v1690_v50 = vld [vmem:[#allocation5 + $0x2f4] ss:$8 sps:$4 sm:$0xff]  }
  0x83   :  { %736 = vmatprep.subr.bf16.mxu1 %v1662_v52  ;;  %v104_v52 = vld [vmem:[#allocation2 + $0x20] sm:$0xff] }
  0x84   :  { %780 = vmatpush1.bf16.msra.mxu0 %v1586_v32  ;;  %v1646_v32 = vld [vmem:[#allocation5 + $0x280] ss:$8 sps:$4 sm:$0xff]  }
  0x85   :  { %781 = vmatprep.subr.bf16.mxu0 %v1587_v33  ;;  %v1654_v33 = vld [vmem:[#allocation5 + $0x294] ss:$8 sps:$4 sm:$0xff]  }
  0x86   :  { %737 = vmatpush1.bf16.msra.mxu1 %v1667_v55  ;;  %v1694_v55 = vld [vmem:[#allocation5 + $0x300] ss:$8 sps:$4 sm:$0xff]  }
  0x87   :  { %738 = vmatprep.subr.bf16.mxu1 %v1668_v56  ;;  %v1886_v56 = vmov 0  }
  0x88   :  { %782 = vmatpush1.bf16.msra.mxu0 %v1589_v36  ;;  %v1652_v36 = vld [vmem:[#allocation5 + $0x290] ss:$8 sps:$4 sm:$0xff]  }
  0x89   :  { %783 = vmatprep.subr.bf16.mxu0 %v1590_v37  ;;  %v1660_v37 = vld [vmem:[#allocation5 + $0x2a4] ss:$8 sps:$4 sm:$0xff]  }
  0x8a   :  { %739 = vmatpush1.bf16.msra.mxu1 %v1673_v62  ;;  %v1714_v62 = vld [vmem:[#allocation7 + $0x30] sm:$0xff]  }
  0x8b   :  { %740 = vmatprep.subr.bf16.mxu1 %v1674_v63  ;;  %v1715_v63 = vld [vmem:[#allocation7 + $0x78] sm:$0xff]  }
  0x8c   :  { %784 = vmatpush1.bf16.msra.mxu0 %v1592_v40  ;;  %v1658_v40 = vld [vmem:[#allocation5 + $0x2a0] ss:$8 sps:$4 sm:$0xff]  }
  0x8d   :  { %785 = vmatprep.subr.bf16.mxu0 %v1593_v41  ;;  %v1666_v41 = vld [vmem:[#allocation5 + $0x2b4] ss:$8 sps:$4 sm:$0xff]  }
  0x8e   :  { %741 = vmatpush1.bf16.msra.mxu1 %v1679_v4 }
  0x8f   :  { %742 = vmatprep.subr.bf16.mxu1 %v1680_v5 }
  0x90   :  { %786 = vmatpush1.bf16.msra.mxu0 %v1595_v44  ;;  %v1672_v44 = vld [vmem:[#allocation5 + $0x2c4] ss:$8 sps:$4 sm:$0xff]  }
  0x91   :  { %787 = vmatprep.subr.bf16.mxu0 %v1596_v45  ;;  %v1670_v45 = vld [vmem:[#allocation5 + $0x2c0] ss:$8 sps:$4 sm:$0xff]  }
  0x92   :  { %743 = vmatpush1.bf16.msra.mxu1 %v1685_v8 }
  0x93   :  { %744 = vmatprep.subr.bf16.mxu1 %v1686_v9  ;;  %v212_v9 = vld [vmem:[%s2053_s2] sm:$0x3] }
  0x94   :  { %788 = vmatpush1.bf16.msra.mxu0 %v1598_v48  ;;  %v1684_v48 = vld [vmem:[#allocation5 + $0x2e4] ss:$8 sps:$4 sm:$0xff]  }
  0x95   :  { %789 = vmatprep.subr.bf16.mxu0 %v1599_v49  ;;  %v1682_v49 = vld [vmem:[#allocation5 + $0x2e0] ss:$8 sps:$4 sm:$0xff]  }
  0x96   :  { %745 = vmatpush1.bf16.msra.mxu1 %v1691_v13 }
  0x97   :  { %746 = vmatprep.subr.bf16.mxu1 %v1692_v14 }
  0x98   :  { %790 = vmatpush1.bf16.msra.mxu0 %v1601_v51  ;;  %v1688_v51 = vld [vmem:[#allocation5 + $0x2f0] ss:$8 sps:$4 sm:$0xff]  }
  0x99   :  { %800 = vmatprep.subr.bf16.mxu0 %v1604_v54  ;;  %v111_v54 = vpack.c.bf16 %v104_v52, %v104_v52 }
  0x9a   :  { %747 = vmatpush1.bf16.msra.mxu1 %v1697_v16 }
  0x9b   :  { %792 = vmatmul.mubr.bf16.vlgmr.msra.gmra.mrb[0].mxu0 %v109_v57  ;;  %748 = vmatprep.subr.bf16.mxu1 %v1698_v17  ;;  %v106_v57 = vld [vmem:[#allocation2 + $0x30] sm:$0xff] }
  0x9c   :  { %801 = vmatpush1.bf16.msra.mxu0 %v1602_v59  ;;  %832 = vmatprep.mubr.bf16.mxu0 %v112_v60  ;;  %v113_v58 = vpack.c.bf16 %v106_v57, %v106_v57  ;;  %v1711_v59 = vld [vmem:[#allocation7 + $0x68] sm:$0xff]  }
  0x9d   :  { %802 = vmatprep.subr.bf16.mxu0 %v1607_v61  ;;  %v1712_v60 = vld [vmem:[#allocation7 + $0x28] sm:$0xff]   ;;  %v1713_v61 = vld [vmem:[#allocation7 + $0x70] sm:$0xff]  }
  0x9e   :  { %749 = vmatpush1.bf16.msra.mxu1 %v1700_v20 }
  0x9f   :  { %1449 = vmatprep.subr.bf16.mxu1 %v1701_v22 }
  0xa0   :  { %803 = vmatpush1.bf16.msra.mxu0 %v1605_v1  ;;  %v1887_v1 = vmov 0.0  }
  0xa1   :  { %804 = vmatprep.subr.bf16.mxu0 %v1612_v3  ;;  %751 = vmatmul.mubr.bf16.vlgmr.msra.gmra.mrb[0].mxu1 %v107_v26  ;;  %v1718_v26 = vld [vmem:[#allocation8 + $0x8] sm:$0xff]  }
  0xa2   :  { %1450 = vmatpush3.bf16.msra.mxu1 %v1702_v25 }
  0xa3   :  { %1451 = vmatprep.subr.bf16.mxu1 %v1703_v27  ;;  %v1719_v27 = vld [vmem:[#allocation8 + $0x10] sm:$0xff]  }
  0xa4   :  { %805 = vmatpush1.bf16.msra.mxu0 %v1610_v6  ;;  %v214_v6 = vlaneseq }
  0xa5   :  { %806 = vmatprep.subr.bf16.mxu0 %v1618_v7 }
  0xa6   :  { %1452 = vmatpush3.bf16.msra.mxu1 %v1704_v30  ;;  %v215_v7 = vshrl.u32 %v214_v6, 7  ;;  %v1722_v30 = vld [vmem:[#allocation8 + $0x28] sm:$0xff]  }
  0xa7   :  { %1453 = vmatprep.subr.bf16.mxu1 %v1705_v31  ;;  %v1723_v31 = vld [vmem:[#allocation8 + $0x30] sm:$0xff]  }
  0xa8   :  { %807 = vmatpush1.bf16.msra.mxu0 %v1616_v10  ;;  %v216_v8 = vsub.s32 0, %v215_v7  ;;  %v220_v10 = vsub.s32 1, %v215_v7 }
  0xa9   :  { %808 = vmatprep.subr.bf16.mxu0 %v1624_v11 }
  0xaa   :  { %1454 = vmatpush3.bf16.msra.mxu1 %v1706_v34  ;;  %v217_v11 = vrot.slane %v212_v9, %v216_v8  ;;  %v1414_v34 = vld [vmem:[%s2055_s4] ss:$0 sm:$0xff] }
  0xab   :  { %1455 = vmatprep.subr.bf16.mxu1 %v1707_v35 }
  0xac   :  { %809 = vmatpush1.bf16.msra.mxu0 %v1622_v12  ;;  %v221_v12 = vrot.slane %v212_v9, %v220_v10 }
  0xad   :  { %810 = vmatprep.subr.bf16.mxu0 %v1630_v15 }
  0xae   :  { %1456 = vmatpush3.bf16.msra.mxu1 %v1708_v38 }
  0xaf   :  { %1457 = vmatprep.subr.bf16.mxu1 %v1709_v39 }
  0xb0   :  { %811 = vmatpush1.bf16.msra.mxu0 %v1628_v18 }
  0xb1   :  { %812 = vmatprep.subr.bf16.mxu0 %v1636_v19 }
  0xb2   :  { %1458 = vmatpush3.bf16.msra.mxu1 %v1710_v42 }
  0xb3   :  { %1459 = vmatprep.subr.bf16.mxu1 %v1711_v59 }
  0xb4   :  { %813 = vmatpush1.bf16.msra.mxu0 %v1634_v23 }
  0xb5   :  { %814 = vmatprep.subr.bf16.mxu0 %v1642_v24  ;;  %v1717_v24 = vld [vmem:[#allocation8] sm:$0xff]  }
  0xb6   :  { %1460 = vmatpush3.bf16.msra.mxu1 %v1712_v60 }
  0xb7   :  { %1461 = vmatprep.subr.bf16.mxu1 %v1713_v61 }
  0xb8   :  { %815 = vmatpush1.bf16.msra.mxu0 %v1640_v28  ;;  %v1720_v28 = vld [vmem:[#allocation8 + $0x18] sm:$0xff]  }
  0xb9   :  { %816 = vmatprep.subr.bf16.mxu0 %v1648_v29  ;;  %v1721_v29 = vld [vmem:[#allocation8 + $0x20] sm:$0xff]  }
  0xba   :  { %1462 = vmatpush3.bf16.msra.mxu1 %v1714_v62 }
  0xbb   :  { %1463 = vmatprep.subr.bf16.mxu1 %v1715_v63 }
  0xbc   :  { %817 = vmatpush1.bf16.msra.mxu0 %v1646_v32  ;;  %v1724_v32 = vld [vmem:[#allocation8 + $0x38] sm:$0xff]  }
  0xbd   :  { %818 = vmatprep.subr.bf16.mxu0 %v1654_v33 }
  0xbe   :  { %1464 = vmatpush3.bf16.msra.mxu1 %v1716_v0 }
  0xbf   :  { %1489 = vmatprep.subr.bf16.mxu1 %v1887_v1 }
  0xc0   :  { %819 = vmatpush1.bf16.msra.mxu0 %v1652_v36 }
  0xc1   :  { %820 = vmatprep.subr.bf16.mxu0 %v1660_v37 }
  0xc4   :  { %821 = vmatpush1.bf16.msra.mxu0 %v1658_v40 }
  0xc5   :  { %822 = vmatprep.subr.bf16.mxu0 %v1666_v41  ;;  %v1725_v41 = vld [vmem:[#allocation10] sm:$0xff]  }
  0xc8   :  { %823 = vmatpush1.bf16.msra.mxu0 %v1664_v43  ;;  %v1726_v43 = vld [vmem:[#allocation10 + $0x8] sm:$0xff]  }
  0xc9   :  { %824 = vmatprep.subr.bf16.mxu0 %v1672_v44  ;;  %v1727_v44 = vld [vmem:[#allocation10 + $0x10] sm:$0xff]  }
  0xcc   :  { %825 = vmatpush1.bf16.msra.mxu0 %v1670_v45  ;;  %v1728_v45 = vld [vmem:[#allocation10 + $0x18] sm:$0xff]  }
  0xcd   :  { %826 = vmatprep.subr.bf16.mxu0 %v1678_v46  ;;  %v1729_v46 = vld [vmem:[#allocation10 + $0x20] sm:$0xff]  }
  0xd0   :  { %827 = vmatpush1.bf16.msra.mxu0 %v1676_v47  ;;  %v1730_v47 = vld [vmem:[#allocation10 + $0x28] sm:$0xff]  }
  0xd1   :  { %828 = vmatprep.subr.bf16.mxu0 %v1684_v48  ;;  %v1731_v48 = vld [vmem:[#allocation10 + $0x30] sm:$0xff]  }
  0xd4   :  { %829 = vmatpush1.bf16.msra.mxu0 %v1682_v49  ;;  %v1732_v49 = vld [vmem:[#allocation10 + $0x38] sm:$0xff]  }
  0xd5   :  { %830 = vmatprep.subr.bf16.mxu0 %v1690_v50  ;;  %v1431_v50 = vld [vmem:[%s2057_s6] ss:$0 sm:$0xff]  ;;  %s1889_s6 = smov [#allocation11]  }
  0xd6   :  { %s1304_s11 = sshll.u32 %s1889_s6, 4  ;;  %s1305_s11 = int_to_ptr.vmem [resolvable:$true] %s1304_s11 }
  0xd7   :  { %p1852_p13 = scmp.lt.s32.totalorder %s1305_s11, %s1305_s11 }
  0xd8   :  { %831 = vmatpush1.bf16.msra.mxu0 %v1688_v51 }
  0xd9   :  { %841 = vmatprep.subr.bf16.mxu0 %v1696_v53 }
  0xdb   :  { %833 = vmatmul.mubr.bf16.vlgmr.msra.gmra.mrb[0].mxu0 %v111_v54 }
  0xdc   :  { %842 = vmatpush1.bf16.msra.mxu0 %v1694_v55  ;;  %873 = vmatprep.mubr.bf16.mxu0 %v1886_v56 }
  0xe7   :  { %1413 = vmatmul.mubr.msk.bf16.vlgmr.msra.gmra.mrb[0].mxu0 %vm714_vm0, %v113_v58  ;;  %v1440_v58 = vld [vmem:[%s2059_s8] ss:$0 sm:$0xff]  ;;  %s1847_s8 = scalar_lea.vmem %s1305_s11, 128 }
  0xe8   :  { %p1848_p12 = scmp.ne.s32.totalorder %s1305_s11, %s1847_s8  ;;  %p1853_p0 = scmp.lt.s32.totalorder %s1847_s8, %s1847_s8 }
  0xea   :  { %p1854_p1 = por %p1853_p0, %p1852_p13 }
  0xec   :  { %p1855_p2 = pnand %p1854_p1, %p1848_p12 }
 0x174   :  { %v752_v2 = vpop.f32.mrb[0].mxu1 }
 0x175   :  { %v754_v3 = vpop.f32.mrb[1].mxu1  ;;  %v753_v13 = vadd.f32 %v752_v2, %v217_v11 }
 0x176   :  { %v756_v4 = vpop.f32.mrb[2].mxu1  ;;  %v755_v14 = vadd.f32 %v754_v3, %v221_v12 }
 0x177   :  { %v757_v5 = vpop.f32.mrb[3].mxu1 }
 0x1ba   :  { %v875_v15 = vpop.f32.mrb[0].mxu0 }
 0x1bb   :  { %v1530_v16 = vadd.f32 %v875_v15, %v753_v13  ;;  %v877_v17 = vpop.f32.mrb[1].mxu0 }
 0x1bc   :  { %v1532_v18 = vadd.f32 %v877_v17, %v755_v14  ;;  %v879_v19 = vpop.f32.mrb[2].mxu0 }
 0x1bd   :  { %v882_v20 = vmax.f32 %v1530_v16, 0.0  ;;  %v880_v21 = vpop.f32.mrb[3].mxu0 }
 0x1be   :  { %v883_v22 = vmax.f32 %v1532_v18, 0.0 }
 0x1bf   :  { %v884_v25 = vpack.c.bf16 %v882_v20, %v882_v20 }
 0x1c0   :  { %v885_v23 = vpack.c.bf16 %v883_v22, %v883_v22 }
 0x1c2   :  { %1053 = vmatprep.mubr.bf16.mxu1 %v885_v23 }
 0x1c3   :  { %1054 = vmatmul.mubr.bf16.vlgmr.msra.gmra.mrb[4].mxu1 %v884_v25 }
 0x1c4   :  { %1490 = vmatpush3.bf16.msra.mxu1 %v1717_v24  ;;  %1505 = vmatprep.mubr.msk.bf16.mxu1 %vm1888_vm1, %v1887_v1 }
 0x1c5   :  { %1491 = vmatprep.subr.bf16.mxu1 %v1887_v1 }
 0x1c8   :  { %1492 = vmatpush3.bf16.msra.mxu1 %v1718_v26 }
 0x1c9   :  { %1493 = vmatprep.subr.bf16.mxu1 %v1887_v1 }
 0x1cc   :  { %1494 = vmatpush3.bf16.msra.mxu1 %v1719_v27 }
 0x1cd   :  { %1495 = vmatprep.subr.bf16.mxu1 %v1887_v1 }
 0x1d0   :  { %1496 = vmatpush3.bf16.msra.mxu1 %v1720_v28 }
 0x1d1   :  { %1497 = vmatprep.subr.bf16.mxu1 %v1887_v1 }
 0x1d4   :  { %1498 = vmatpush3.bf16.msra.mxu1 %v1721_v29 }
 0x1d5   :  { %1499 = vmatprep.subr.bf16.mxu1 %v1887_v1 }
 0x1d8   :  { %1500 = vmatpush3.bf16.msra.mxu1 %v1722_v30 }
 0x1d9   :  { %1501 = vmatprep.subr.bf16.mxu1 %v1887_v1 }
 0x1dc   :  { %1502 = vmatpush3.bf16.msra.mxu1 %v1723_v31 }
 0x1dd   :  { %1503 = vmatprep.subr.bf16.mxu1 %v1887_v1 }
 0x1e0   :  { %1504 = vmatpush3.bf16.msra.mxu1 %v1724_v32 }
 0x1e1   :  { %1509 = vmatprep.subr.bf16.mxu1 %v1887_v1 }
 0x296   :  { %v1465_v33 = vpop.f32.mrb[4].mxu1 }
 0x297   :  { %v1466_v35 = vpop.f32.mrb[5].mxu1 }
 0x298   :  { %v1467_v36 = vadd.f32 %v1466_v35, %v1465_v33  ;;  %v1468_v37 = vpop.f32.mrb[6].mxu1 }
 0x299   :  { %v1469_v38 = vpop.f32.mrb[7].mxu1 }
 0x29a   :  { %v1056_v39 = vadd.f32 %v1467_v36, %v1414_v34 }
 0x29c   :  { %v1061_v40 = vmax.f32 %v1056_v39, 0.0 }
 0x29e   :  { %v1062_v42 = vpack.c.bf16 %v1061_v40, %v1061_v40 }
 0x2a0   :  { %1506 = vmatmul.mubr.bf16.vlgmr.msra.gmra.mrb[8].mxu1 %v1062_v42 }
 0x2a1   :  { %1510 = vmatpush3.bf16.msra.mxu1 %v1725_v41  ;;  %1525 = vmatprep.mubr.msk.bf16.mxu1 %vm1888_vm1, %v1887_v1 }
 0x2a2   :  { %1511 = vmatprep.subr.bf16.mxu1 %v1887_v1 }
 0x2a5   :  { %1512 = vmatpush3.bf16.msra.mxu1 %v1726_v43 }
 0x2a6   :  { %1513 = vmatprep.subr.bf16.mxu1 %v1887_v1 }
 0x2a9   :  { %1514 = vmatpush3.bf16.msra.mxu1 %v1727_v44 }
 0x2aa   :  { %1515 = vmatprep.subr.bf16.mxu1 %v1887_v1 }
 0x2ad   :  { %1516 = vmatpush3.bf16.msra.mxu1 %v1728_v45 }
 0x2ae   :  { %1517 = vmatprep.subr.bf16.mxu1 %v1887_v1 }
 0x2b1   :  { %1518 = vmatpush3.bf16.msra.mxu1 %v1729_v46 }
 0x2b2   :  { %1519 = vmatprep.subr.bf16.mxu1 %v1887_v1 }
 0x2b5   :  { %1520 = vmatpush3.bf16.msra.mxu1 %v1730_v47 }
 0x2b6   :  { %1521 = vmatprep.subr.bf16.mxu1 %v1887_v1 }
 0x2b9   :  { %1522 = vmatpush3.bf16.msra.mxu1 %v1731_v48 }
 0x2ba   :  { %1523 = vmatprep.subr.bf16.mxu1 %v1887_v1 }
 0x2bd   :  { %1524 = vmatpush3.bf16.msra.mxu1 %v1732_v49 }
 0x373   :  { %v1168_v51 = vpop.f32.mrb[8].mxu1 }
 0x374   :  { %v1169_v52 = vadd.f32 %v1431_v50, %v1168_v51  ;;  %v1507_v53 = vpop.f32.mrb[9].mxu1 }
 0x375   :  { %v1171_v54 = vpop.f32.mrb[10].mxu1 }
 0x376   :  { %v1174_v55 = vmax.f32 %v1169_v52, 0.0  ;;  %v1508_v56 = vpop.f32.mrb[11].mxu1 }
 0x378   :  { %v1175_v57 = vpack.c.bf16 %v1174_v55, %v1174_v55 }
 0x37a   :  { %1526 = vmatmul.mubr.bf16.vlgmr.msra.gmra.mrb[12].mxu1 %v1175_v57 }
 0x44d   :  { %v1281_v59 = vpop.f32.mrb[12].mxu1 }
 0x44e   :  { %v1282_v60 = vadd.f32 %v1440_v58, %v1281_v59  ;;  %v1527_v61 = vpop.f32.mrb[13].mxu1 }
 0x44f   :  { %v1284_v62 = vpop.f32.mrb[14].mxu1 }
 0x450   :  { %1287 = vmax.xlane.f32.xlu0 %v1282_v60  ;;  %v1528_v63 = vpop.f32.mrb[15].mxu1 }
 0x4dd   :  { %v1288_v0 = vpop.xlane.xlu0 %1287 }
 0x4de   :  { %v1289_v1 = vsub.f32 %v1282_v60, %v1288_v0 }
 0x4e0   :  { %v1290_v2 = vmul.f32 1.442695, %v1289_v1 }
 0x4e2   :  { %1733 = vpow2.f32 %v1290_v2 }
 0x4ec   :  { %v1734_v3 = vpop.eup %1733 }
 0x4ed   :  { %1292 = vadd.xlane.f32.xlu0 %v1734_v3 }
 0x57a   :  { %v1293_v4 = vpop.xlane.xlu0 %1292 }
 0x57b   :  { %1735 = vlog2.f32 %v1293_v4 }
 0x585   :  { %v1736_v5 = vpop.eup %1735 }
 0x586   :  { %v1295_v6 = vmul.f32 0.6931472, %v1736_v5 }
 0x588   :  { %v1296_v7 = vsub.f32 %v1289_v1, %v1295_v6 }
 0x58a   :  { %1297 = vst [vmem:[#allocation11] sm:$0xff] %v1296_v7 }
 0x58b   :  { %1858 = shalt.err (!%p1855_p2)
}
 0x58c   :  { %s1859_s1 = scalar_lea.hbm %s2060_s9, 128 }
 0x58d   :  { %p1860_p3 = scmp.ne.s32.totalorder %s2060_s9, %s1859_s1  ;;  %p1863_p4 = scmp.lt.u32.totalorder %s1859_s1, %s2060_s9 }
 0x58f   :  { %p1865_p5 = pnand %p1863_p4, %p1860_p3 }
 0x591   :  { %1868 = shalt.err (!%p1865_p5)
}
 0x592   :  { %1307 = dma.vmem_to_hbm [thread:$0]  %s1305_s11, 128, %s2060_s9, [#allocation4]  }
 0x593   :  { %1875 = dma.done.wait [#allocation4], 128  }
 0x594   :  { %1876 = vsyncadd [#allocation4], 4294967168 }
 0x595   :  { %1311 = vsyncpa [#allocation3], 1 }
 0x596   :  { %1312 = vsyncpa [#allocation6], 1 }
 0x597   :  { %1313 = vsyncpa [#allocation9], 1 }
 0x598   :  { %1314 = vsyncpa [#allocation4], 1 }

</bundles_post_ra>
